<compile_context>
chip_gen: v6e
topology: v6e:2x2x1
jax: 0.10.0
libtpu: 0.0.40
codegen_flags: <defaults>
</compile_context>

<pallas_src>
import functools
import math

import jax
import jax.numpy as jnp
from jax.experimental import pallas as pl
from jax.experimental.pallas import tpu as pltpu

_LANES = 128
_TARGET_BLOCK_BYTES = 1 << 20  # ~1 MiB output block: ~85% HBM roofline, small VMEM


def _round_up(n: int, m: int) -> int:
    return ((n + m - 1) // m) * m


def _cdiv(a: int, b: int) -> int:
    return (a + b - 1) // b


def _pick_block_rows(rows_needed: int, sub: int, row_bytes: int,
                     target_bytes: int) -> int:
    """Rows per output block: ~target_bytes per block, sublane-aligned, and
    split into >= 2 grid steps when there is enough work (v7x megacore)."""
    target_rows = max(sub, (target_bytes // row_bytes) // sub * sub)
    block = min(target_rows, _round_up(rows_needed, sub))
    if rows_needed >= 2 * sub:
        block = min(block, _round_up(_cdiv(rows_needed, 2), sub))
    return max(sub, block)


def _sinusoidal_kernel_packed(dim, r, x_ref, table_ref, out_ref):
    # x_ref:     (TBR, r)    f32  r timesteps per lane-dense output row
    # table_ref: (2, 128)    f32  row0 = [freqs|freqs] tiled r times
    #                             row1 = [0...0|pi/2..pi/2] tiled r times
    # out_ref:   (TBR, 128)  out dtype
    x = x_ref[...]
    tbr = x.shape[0]
    # Lane-dense broadcast: timestep k replicated across its dim-lane slot.
    parts = [jnp.broadcast_to(x[:, k:k + 1], (tbr, dim)) for k in range(r)]
    xb = jnp.concatenate(parts, axis=-1)                      # (TBR, 128)
    ang = xb * table_ref[0:1, :] + table_ref[1:2, :]          # f32 math
    out_ref[...] = jnp.sin(ang).astype(out_ref.dtype)         # one full-width sin + store


def _sinusoidal_kernel_wide(x_ref, table_ref, out_ref):
    # x_ref: (TB, 1) f32, table_ref: (2, dim) f32, out_ref: (TB, dim)
    ang = x_ref[...] * table_ref[0:1, :] + table_ref[1:2, :]
    out_ref[...] = jnp.sin(ang).astype(out_ref.dtype)


def sinusoidal_pos_emb(x: jax.Array, dim: int, *,
                       out_dtype=jnp.float32,
                       target_block_bytes: int = _TARGET_BLOCK_BYTES,
                       core_parallel: bool = False) -> jax.Array:
    """x: (B,) timesteps. Returns (B, dim) sinusoidal embedding = [sin | cos]."""
    assert dim % 2 == 0 and dim >= 4, "dim must be an even number >= 4"
    B = x.shape[0]
    half = dim // 2

    # Constant tables built once at trace time (hoisted out of the kernel).
    scale = math.log(10000.0) / (half - 1)
    freqs = jnp.exp(jnp.arange(half, dtype=jnp.float32) * jnp.float32(-scale))
    freqs_full = jnp.concatenate([freqs, freqs])                              # (dim,)
    phase_full = jnp.concatenate(
        [jnp.zeros((half,), jnp.float32),
         jnp.full((half,), math.pi / 2.0, dtype=jnp.float32)])                # (dim,)

    itemsize = jnp.dtype(out_dtype).itemsize
    sub = 16 if itemsize == 2 else 8          # bf16 packs 2 rows per sublane
    sem = pltpu.CORE_PARALLEL if core_parallel else pltpu.PARALLEL
    cparams = pltpu.CompilerParams(dimension_semantics=(sem,))

    x_f32 = x.astype(jnp.float32)

    if dim < _LANES and _LANES % dim == 0:
        # --- lane-dense path: pack r = 128//dim embeddings per output row ---
        r = _LANES // dim
        table = jnp.stack([jnp.tile(freqs_full, r),
                           jnp.tile(phase_full, r)])                          # (2, 128)

        rows_needed = _cdiv(B, r)
        tbr = _pick_block_rows(rows_needed, sub, _LANES * itemsize,
                               target_block_bytes)
        bp_rows = _round_up(rows_needed, tbr)
        bp = bp_rows * r
        if bp != B:
            x_f32 = jnp.pad(x_f32, (0, bp - B))   # padded rows sliced off below
        x_pack = x_f32.reshape(bp_rows, r)

        out = pl.pallas_call(
            functools.partial(_sinusoidal_kernel_packed, dim, r),
            out_shape=jax.ShapeDtypeStruct((bp_rows, _LANES), out_dtype),
            grid=(bp_rows // tbr,),
            in_specs=[
                pl.BlockSpec((tbr, r), lambda i: (i, 0)),      # timesteps tile
                pl.BlockSpec((2, _LANES), lambda i: (0, 0)),   # fused freq/phase table
            ],
            out_specs=pl.BlockSpec((tbr, _LANES), lambda i: (i, 0)),
            compiler_params=cparams,
        )(x_pack, table)
        out = out.reshape(bp, dim)                 # row-major view: 128 = r*dim
        return out[:B] if bp != B else out

    # --- wide path: dim >= 128 (already lane-dense when dim % 128 == 0) ---
    # TODO(synk): dim < 128 with 128 % dim != 0 also lands here and keeps
    # masked stores; pack to lcm(dim, 128) lanes if such dims ever matter.
    table = jnp.stack([freqs_full, phase_full])                               # (2, dim)
    tb = _pick_block_rows(B, sub, dim * itemsize, target_block_bytes)
    bp = _round_up(B, tb)
    x2d = x_f32.reshape(B, 1)
    if bp != B:
        x2d = jnp.pad(x2d, ((0, bp - B), (0, 0)))
    out = pl.pallas_call(
        _sinusoidal_kernel_wide,
        out_shape=jax.ShapeDtypeStruct((bp, dim), out_dtype),
        grid=(bp // tb,),
        in_specs=[
            pl.BlockSpec((tb, 1), lambda i: (i, 0)),
            pl.BlockSpec((2, dim), lambda i: (0, 0)),
        ],
        out_specs=pl.BlockSpec((tb, dim), lambda i: (i, 0)),
        compiler_params=cparams,
    )(x2d, table)
    return out[:B] if bp != B else out


def _reference(x: jax.Array, dim: int) -> jax.Array:
    half = dim // 2
    emb = math.log(10000.0) / (half - 1)
    freqs = jnp.exp(jnp.arange(half, dtype=jnp.float32) * -emb)
    ang = x.astype(jnp.float32)[:, None] * freqs[None, :]
    return jnp.concatenate([jnp.sin(ang), jnp.cos(ang)], axis=-1)


if __name__ == "__main__":
    key = jax.random.PRNGKey(0)

    # Case 1: module-typical tiny shape (B=8, dim=32) -> lane-dense path, 1 tile.
    B1, dim1 = 8, 32
    x1 = jax.random.uniform(key, (B1,), dtype=jnp.float32) * 1000.0
    out1 = jax.block_until_ready(sinusoidal_pos_emb(x1, dim1))
    ref1 = _reference(x1, dim1)
    assert out1.shape == (B1, dim1) and out1.dtype == jnp.float32
    assert jnp.allclose(out1, ref1, atol=2.5e-4, rtol=1e-5), "mismatch (case 1)"

    # Case 2: lane-dense path, multiple grid steps + batch remainder/padding.
    B2, dim2 = 40, 32
    x2 = jax.random.uniform(jax.random.PRNGKey(1), (B2,), dtype=jnp.float32) * 1000.0
    out2 = jax.block_until_ready(
        sinusoidal_pos_emb(x2, dim2, target_block_bytes=4096))
    ref2 = _reference(x2, dim2)
    assert out2.shape == (B2, dim2)
    assert jnp.allclose(out2, ref2, atol=2.5e-4, rtol=1e-5), "mismatch (case 2)"

    # Case 3: wide path (dim a multiple of 128 -> already lane-dense layout).
    B3, dim3 = 8, 256
    x3 = jax.random.uniform(jax.random.PRNGKey(2), (B3,), dtype=jnp.float32) * 1000.0
    out3 = jax.block_until_ready(sinusoidal_pos_emb(x3, dim3))
    ref3 = _reference(x3, dim3)
    assert out3.shape == (B3, dim3)
    assert jnp.allclose(out3, ref3, atol=2.5e-4, rtol=1e-5), "mismatch (case 3)"

    # Case 4: bf16 output path (f32 math, bf16 store; 16-row sublane blocks).
    out4 = jax.block_until_ready(
        sinusoidal_pos_emb(x2, dim2, out_dtype=jnp.bfloat16))
    assert out4.shape == (B2, dim2) and out4.dtype == jnp.bfloat16
    assert jnp.allclose(out4.astype(jnp.float32), ref2, atol=2e-2), "mismatch (case 4)"

    print("KERNEL_OK")
</pallas_src>

<mosaic_0001>
module attributes {stable_mosaic.version = 11 : i64} {
  func.func @_sinusoidal_kernel_packed(%arg0: i32, %arg1: memref<8x4xf32, #tpu.memory_space<vmem>>, %arg2: memref<2x128xf32, #tpu.memory_space<vmem>>, %arg3: memref<8x128xf32, #tpu.memory_space<vmem>>) attributes {dimension_semantics = [#tpu.dimension_semantics<parallel>], iteration_bounds = array<i64: 1>, scalar_prefetch = 0 : i64, scratch_operands = 0 : i64, tpu.core_type = #tpu.core_type<tc>, window_params = [{transform_indices = @transform_0, window_bounds = array<i64: 8, 4>}, {pipeline_mode = #tpu.pipeline_mode<synchronous>, transform_indices = @transform_1, window_bounds = array<i64: 2, 128>}, {transform_indices = @transform_2, window_bounds = array<i64: 8, 128>}]} {
    %c0 = arith.constant 0 : index
    %c0_0 = arith.constant 0 : index
    %0 = vector.load %arg1[%c0, %c0_0] : memref<8x4xf32, #tpu.memory_space<vmem>>, vector<8x4xf32>
    %1 = vector.extract_strided_slice %0 {offsets = [0, 0], sizes = [8, 1], strides = [1, 1]} : vector<8x4xf32> to vector<8x1xf32>
    %2 = vector.shape_cast %1 : vector<8x1xf32> to vector<8x1xf32>
    %3 = vector.broadcast %2 : vector<8x1xf32> to vector<8x32xf32>
    %4 = vector.extract_strided_slice %0 {offsets = [0, 1], sizes = [8, 1], strides = [1, 1]} : vector<8x4xf32> to vector<8x1xf32>
    %5 = vector.shape_cast %4 : vector<8x1xf32> to vector<8x1xf32>
    %6 = vector.broadcast %5 : vector<8x1xf32> to vector<8x32xf32>
    %7 = vector.extract_strided_slice %0 {offsets = [0, 2], sizes = [8, 1], strides = [1, 1]} : vector<8x4xf32> to vector<8x1xf32>
    %8 = vector.shape_cast %7 : vector<8x1xf32> to vector<8x1xf32>
    %9 = vector.broadcast %8 : vector<8x1xf32> to vector<8x32xf32>
    %10 = vector.extract_strided_slice %0 {offsets = [0, 3], sizes = [8, 1], strides = [1, 1]} : vector<8x4xf32> to vector<8x1xf32>
    %11 = vector.shape_cast %10 : vector<8x1xf32> to vector<8x1xf32>
    %12 = vector.broadcast %11 : vector<8x1xf32> to vector<8x32xf32>
    %13 = tpu.concatenate %3, %6, %9, %12 in 1 : vector<8x32xf32>, vector<8x32xf32>, vector<8x32xf32>, vector<8x32xf32> -> vector<8x128xf32>
    %c0_1 = arith.constant 0 : index
    %c0_2 = arith.constant 0 : index
    %14 = vector.load %arg2[%c0_1, %c0_2] : memref<2x128xf32, #tpu.memory_space<vmem>>, vector<1x128xf32>
    %15 = vector.broadcast %14 : vector<1x128xf32> to vector<8x128xf32>
    %16 = arith.mulf %13, %15 : vector<8x128xf32>
    %c1 = arith.constant 1 : index
    %c0_3 = arith.constant 0 : index
    %17 = vector.load %arg2[%c1, %c0_3] : memref<2x128xf32, #tpu.memory_space<vmem>>, vector<1x128xf32>
    %18 = vector.broadcast %17 : vector<1x128xf32> to vector<8x128xf32>
    %19 = arith.addf %16, %18 : vector<8x128xf32>
    %20 = math.sin %19 : vector<8x128xf32>
    %c0_4 = arith.constant 0 : index
    %c0_5 = arith.constant 0 : index
    %21 = vector.load %arg3[%c0_4, %c0_5] : memref<8x128xf32, #tpu.memory_space<vmem>>, vector<8x128xf32>
    tpu.vector_store %arg3[%c0_4, %c0_5], %20 {strides = array<i32>} : memref<8x128xf32, #tpu.memory_space<vmem>>, vector<8x128xf32>,
    return
  }
  func.func @transform_0(%arg0: i32) -> (i32, i32) {
    %c0_i32 = arith.constant 0 : i32
    %c0_i32_0 = arith.constant 0 : i32
    return %arg0, %c0_i32 : i32, i32
  }
  func.func @transform_1(%arg0: i32) -> (i32, i32) {
    %c0_i32 = arith.constant 0 : i32
    %c0_i32_0 = arith.constant 0 : i32
    %c0_i32_1 = arith.constant 0 : i32
    return %c0_i32, %c0_i32_0 : i32, i32
  }
  func.func @transform_2(%arg0: i32) -> (i32, i32) {
    %c0_i32 = arith.constant 0 : i32
    %c0_i32_0 = arith.constant 0 : i32
    return %arg0, %c0_i32 : i32, i32
  }
}

</mosaic_0001>

<bundles_post_ra>
// kernel: tpu_custom_call.1
= control target key start
LH: loop header
LB: loop body
LE: loop exit
PB: predicated region body
PF: predicated region fallthrough
CT: control target
= control target key end

     0   :  { %v219_v1 = vmov 0   ;;  %v220_v2 = vmov 2   ;;  %s278_s0 = inlined_call_operand.vmem [shape: f32[8,4], index: 0, kind: input, shape index: {}]   ;;  %s279_s1 = inlined_call_operand.vmem [shape: f32[2,128], index: 1, kind: input, shape index: {}]   ;;  %s280_s2 = inlined_call_operand.hbm [shape: f32[8,128], index: 2, kind: output, shape index: {}]  }
   0x1   :  { %v12_v0 = vld [vmem:[%s278_s0] sm:$0xff]  ;;  %188 = vset.pattern.permute.xlu0 %v219_v1  ;;  %190 = vset.pattern.permute.xlu1 %v220_v2 }
   0x2   :  { %7 = vsyncpa [#allocation3], 0  ;;  %15 = vperm.xlu0 %188, %v12_v0   ;;  %23 = vperm.xlu1 %190, %v12_v0   ;;  %v221_v3 = vmov 1   ;;  %v222_v4 = vmov 3   ;;  %vm30_vm0 = vcmask 261120   ;;  %vm32_vm1 = vcmask 523264  }
   0x3   :  { %vm34_vm2 = vcmask 785408   ;;  %v167_v10 = vld [vmem:[%s279_s1] ss:$0 sm:$0xff]  ;;  %v168_v12 = vld [vmem:[%s279_s1 + $0x1] ss:$0 sm:$0xff]  ;;  %s229_s1 = smov [#allocation2]  }
   0x4   :  { %v223_v26 = vmov 683565275   ;;  %v224_v28 = vmov 2475754826   ;;  %v225_v31 = vmov 2131351028  }
   0x5   :  { %v226_v34 = vmov 2102212464   ;;  %v227_v37 = vmov 920167782   ;;  %v228_v40 = vmov 1326507024  }
   0x6   :  { %189 = vset.pattern.permute.xlu0 %v221_v3  ;;  %191 = vset.pattern.permute.xlu1 %v222_v4  ;;  %s159_s14 = sshll.u32 %s229_s1, 4  ;;  %s160_s14 = int_to_ptr.vmem [resolvable:$true] %s159_s14 }
   0x7   :  { %19 = vperm.xlu0 %189, %v12_v0   ;;  %27 = vperm.xlu1 %191, %v12_v0   ;;  %s197_s15 = scalar_lea.vmem %s160_s14, 128  ;;  %p202_p1 = scmp.lt.s32.totalorder %s160_s14, %s160_s14 }
   0x8   :  { %p198_p0 = scmp.ne.s32.totalorder %s160_s14, %s197_s15  ;;  %p203_p2 = scmp.lt.s32.totalorder %s197_s15, %s197_s15 }
   0xa   :  { %p204_p3 = por %p203_p2, %p202_p1 }
   0xb   :  { %192 = vset.pattern.permute.xlu0 %v222_v4 }
   0xc   :  { %p205_p4 = pnand %p204_p3, %p198_p0 }
  0x7d   :  { %v16_v5 = vpop.permute.xlu0 %15  ;;  %v24_v6 = vpop.permute.xlu1 %23 }
  0x82   :  { %v20_v7 = vpop.permute.xlu0 %19  ;;  %v28_v8 = vpop.permute.xlu1 %27 }
  0x83   :  { %v31_v9 = vsel %vm30_vm0, %v16_v5, %v20_v7 }
  0x84   :  { %v33_v11 = vsel %vm32_vm1, %v31_v9, %v24_v6 }
  0x85   :  { %v35_v13 = vsel %vm34_vm2, %v33_v11, %v28_v8 }
  0x86   :  { %v41_v14 = vmul.f32 %v167_v10, %v35_v13 }
  0x88   :  { %v254_v15 = vadd.f32 %v168_v12, %v41_v14 }
  0x8a   :  { %v51_v16 = vand.u32 2139095040, %v254_v15  ;;  %v48_v20 = vand.u32 2147483647, %v254_v15  ;;  %vm50_vm10 = vcmp.lt.s32.totalorder %v254_v15, 0  ;;  %vm140_vm15 = vweird.f32 %v254_v15 }
  0x8c   :  { %v52_v17 = vshrl.u32 %v51_v16, 23  ;;  %v55_v24 = vand.u32 8388607, %v48_v20  ;;  %vm49_vm11 = vcmp.le.f32.partialorder %v48_v20, 0.7853982 }
  0x8e   :  { %v169_v18 = vadd.s32 4294967169, %v52_v17  ;;  %v56_v42 = vor.u32 8388608, %v55_v24 }
  0x90   :  { %v58_v19 = vadd.s32 1, %v169_v18  ;;  %v96_v56 = vshll.u32 %v56_v42, 8 }
  0x92   :  { %vm59_vm3 = vcmp.gt.s32.totalorder %v58_v19, 0 }
  0x93   :  { %v60_v21 = vsel %vm59_vm3, %v58_v19, 0 }
  0x94   :  { %v62_v22 = vand.u32 31, %v60_v21  ;;  %v61_v25 = vshrl.u32 %v60_v21, 5 }
  0x96   :  { %v63_v23 = vsub.s32 32, %v62_v22  ;;  %v65_v27 = vshll.u32 %v223_v26, %v62_v22  ;;  %v68_v29 = vshll.u32 %v224_v28, %v62_v22  ;;  %v71_v33 = vshll.u32 %v225_v31, %v62_v22 }
  0x97   :  { %v74_v36 = vshll.u32 %v226_v34, %v62_v22  ;;  %v77_v39 = vshll.u32 %v227_v37, %v62_v22  ;;  %vm80_vm4 = vcmp.lt.s32.totalorder %v61_v25, 1  ;;  %vm83_vm5 = vcmp.lt.s32.totalorder %v61_v25, 4 }
  0x98   :  { %v66_v30 = vshrl.u32 %v224_v28, %v63_v23  ;;  %v69_v32 = vshrl.u32 %v225_v31, %v63_v23  ;;  %v72_v35 = vshrl.u32 %v226_v34, %v63_v23  ;;  %v75_v38 = vshrl.u32 %v227_v37, %v63_v23 }
  0x99   :  { %v78_v41 = vshrl.u32 %v228_v40, %v63_v23  ;;  %v64_v51 = vshrl.u32 %v223_v26, %v63_v23  ;;  %vm82_vm6 = vcmp.lt.s32.totalorder %v61_v25, 3  ;;  %vm81_vm7 = vcmp.lt.s32.totalorder %v61_v25, 2 }
  0x9a   :  { %v67_v43 = vor.u32 %v66_v30, %v65_v27  ;;  %v70_v44 = vor.u32 %v69_v32, %v68_v29  ;;  %v73_v45 = vor.u32 %v72_v35, %v71_v33  ;;  %v76_v46 = vor.u32 %v75_v38, %v74_v36 }
  0x9b   :  { %v79_v47 = vor.u32 %v78_v41, %v77_v39 }
  0x9c   :  { %v85_v48 = vsel %vm83_vm5, %v73_v45, 2102212464  ;;  %v88_v49 = vsel %vm80_vm4, %v67_v43, %v70_v44  ;;  %v92_v50 = vsel %vm80_vm4, %v70_v44, %v73_v45  ;;  %v89_v52 = vsel %vm83_vm5, %v76_v46, 920167782 }
  0x9d   :  { %v93_v53 = vsel %vm83_vm5, %v79_v47, 1326507024  ;;  %v90_v54 = vsel %vm82_vm6, %v73_v45, %v89_v52  ;;  %v84_v57 = vsel %vm80_vm4, %v64_v51, %v67_v43  ;;  %v86_v58 = vsel %vm82_vm6, %v70_v44, %v85_v48 }
  0x9e   :  { %v94_v55 = vsel %vm82_vm6, %v76_v46, %v93_v53  ;;  %v91_v59 = vsel %vm81_vm7, %v88_v49, %v90_v54  ;;  %v87_v1 = vsel %vm81_vm7, %v84_v57, %v86_v58 }
  0x9f   :  { %v95_v60 = vsel %vm81_vm7, %v92_v50, %v94_v55  ;;  %v263_v63 = vmul.u32.u64.low %v96_v56, %v91_v59  ;;  %v264_v0 = vmul.u32.u64.high %v96_v56, %v91_v59, %v263_v63  ;;  %v103_v3 = vmul.u32 %v96_v56, %v87_v1 }
  0xa0   :  { %v260_v61 = vmul.u32.u64.low %v96_v56, %v95_v60  ;;  %v261_v62 = vmul.u32.u64.high %v96_v56, %v95_v60, %v260_v61 }
  0xa1   :  { %v106_v2 = vadd.s32 1, %v264_v0 }
  0xa2   :  { %vm105_vm8 = vc.u32 %v261_v62, %v263_v63  ;;  %v104_v16 = vadd.s32 %v263_v63, %v261_v62 }
  0xa3   :  { %v107_v4 = vsel %vm105_vm8, %v106_v2, %v264_v0 }
  0xa4   :  { %v108_v5 = vadd.s32 %v107_v4, %v103_v3 }
  0xa6   :  { %v109_v6 = vadd.s32 536870912, %v108_v5 }
  0xa8   :  { %v110_v7 = vshrl.u32 %v109_v6, 30 }
  0xaa   :  { %v111_v8 = vshll.u32 %v110_v7, 30  ;;  %v134_v30 = vsub.s32 4, %v110_v7 }
  0xac   :  { %v112_v9 = vsub.s32 %v108_v5, %v111_v8  ;;  %v135_v33 = vsel %vm50_vm10, %v134_v30, %v110_v7 }
  0xad   :  { %v137_v34 = vsel %vm49_vm11, 0, %v135_v33 }
  0xae   :  { %v114_v10 = vsub.s32 0, %v112_v9  ;;  %v141_v35 = vadd.s32 3, %v137_v34 }
  0xb0   :  { %v170_v11 = vmin.u32 %v114_v10, %v112_v9  ;;  %v142_v36 = vand.u32 3, %v141_v35 }
  0xb2   :  { %v116_v12 = vclz %v170_v11  ;;  %vm147_vm12 = vcmp.eq.s32.totalorder %v142_v36, 2  ;;  %vm144_vm13 = vcmp.eq.s32.totalorder %v142_v36, 0  ;;  %vm143_vm14 = vcmp.lt.s32.totalorder %v142_v36, 2 }
  0xb4   :  { %v171_v13 = vadd.s32 4294967294, %v116_v12 }
  0xb6   :  { %vm172_vm9 = vcmp.lt.s32.totalorder %v171_v13, 0 }
  0xb7   :  { %v119_v14 = vsel %vm172_vm9, 0, %v171_v13 }
  0xb8   :  { %v120_v17 = vsub.s32 32, %v119_v14  ;;  %v124_v18 = vsub.s32 4294967266, %v119_v14  ;;  %v121_v19 = vshll.u32 %v112_v9, %v119_v14 }
  0xba   :  { %v122_v21 = vshrl.u32 %v104_v16, %v120_v17  ;;  %v125_v22 = vadd.s32 127, %v124_v18 }
  0xbc   :  { %v123_v23 = vor.u32 %v122_v21, %v121_v19  ;;  %v126_v24 = vshll.u32 %v125_v22, 23 }
  0xbe   :  { %v127_v25 = vor.u32 4788187, %v126_v24  ;;  %v130_v27 = vcvt.s32.f32 %v123_v23 }
  0xc0   :  { %v128_v26 = vand.u32 2147483647, %v127_v25 }
  0xc2   :  { %v131_v28 = vmul.f32 %v130_v27, %v128_v26 }
  0xc4   :  { %v132_v29 = vxor.u32 2147483648, %v131_v28 }
  0xc6   :  { %v133_v31 = vsel %vm50_vm10, %v132_v29, %v131_v28 }
  0xc7   :  { %v136_v32 = vsel %vm49_vm11, %v254_v15, %v133_v31 }
  0xc8   :  { %193 = vcosq.f32 %v136_v32 }
  0xc9   :  { %195 = vsinq.f32 %v136_v32 }
  0xd5   :  { %v194_v37 = vpop.eup %193 }
  0xd6   :  { %v196_v38 = vpop.eup %195  ;;  %v148_v39 = vxor.u32 2147483648, %v194_v37 }
  0xd7   :  { %v145_v40 = vxor.u32 2147483648, %v196_v38 }
  0xd8   :  { %v149_v41 = vsel %vm147_vm12, %v148_v39, %v196_v38 }
  0xd9   :  { %v146_v20 = vsel %vm144_vm13, %v194_v37, %v145_v40 }
  0xda   :  { %v150_v42 = vsel %vm143_vm14, %v146_v20, %v149_v41 }
  0xdb   :  { %v151_v43 = vsel %vm140_vm15, nan, %v150_v42 }
  0xdc   :  { %152 = vst [vmem:[#allocation2] sm:$0xff] %v151_v43 }
  0xdd   :  { %208 = shalt.err (!%p205_p4)
}
  0xde   :  { %162 = dma.vmem_to_hbm [thread:$0]  %s160_s14, 128, %s280_s2, [#allocation3]  }
  0xdf   :  { %217 = dma.done.wait [#allocation3], 128  }
  0xe0   :  { %218 = vsyncadd [#allocation3], 4294967168 }
  0xe1   :  { %166 = vsyncpa [#allocation3], 1 }

</bundles_post_ra>
